<compile_context>
chip_gen: v6e
topology: v6e:2x2x1
jax: 0.10.0
libtpu: 0.0.40
codegen_flags: <defaults>
</compile_context>

<pallas_src>
import jax
import jax.numpy as jnp
from jax import lax
from jax.experimental import pallas as pl
from jax.experimental.pallas import tpu as pltpu

# --- model hyper-parameters (small, consistent with the module's shapes) ---
EMBED_DIM = 32
NUM_HEADS = 4
HEAD_DIM = EMBED_DIM // NUM_HEADS
SCALE = float(HEAD_DIM) ** -0.5
BATCH = 2
SEQ = 8


def fold_scale_into_qkv(w_qkv, embed_dim=EMBED_DIM, scale=SCALE):
    """Parameter-preparation step (done once, outside the per-call path):
    fold the attention scaling into the q-block columns of the qkv weight."""
    return w_qkv.at[:, :embed_dim].multiply(scale)


def vit_attention_block(x, w_qkv_scaled, w_proj, b_proj,
                        *, num_heads=NUM_HEADS, mxu_dtype=jnp.bfloat16):
    """x: (B, N, E) float32.  w_qkv_scaled: (E, 3E) with SCALE pre-folded into
    the q columns.  w_proj: (E, E).  b_proj: (1, E).  Returns (B, N, E)."""
    B, N, E = x.shape
    H = num_heads
    D = E // H
    BN = B * N

    # bf16 MXU operands (v6e/v7x native rate, halves DMA bytes); f32 accumulate.
    x2 = x.reshape(BN, E).astype(mxu_dtype)
    w_qkv_c = w_qkv_scaled.astype(mxu_dtype)
    w_proj_c = w_proj.astype(mxu_dtype)
    b_proj_c = b_proj.astype(jnp.float32)

    def kernel(x_ref, wqkv_ref, wproj_ref, bproj_ref, o_ref):
        # x_ref:    (BN, E)  mxu_dtype   -- all batch rows in one slab
        # wqkv_ref: (E, 3E)  mxu_dtype   -- q columns pre-scaled by SCALE
        # wproj_ref:(E, E)   mxu_dtype
        # bproj_ref:(1, E)   f32
        # o_ref:    (BN, E)  f32
        xs = x_ref[...]
        w_qkv = wqkv_ref[...]
        w_proj = wproj_ref[...]

        # One MXU call for the qkv projection of every row of every batch elem.
        qkv = jnp.dot(xs, w_qkv, preferred_element_type=jnp.float32)  # (BN, 3E) f32

        proj_rows = []
        for b in range(B):                       # static loop, B is tiny
            qkv_b = qkv[b * N:(b + 1) * N, :]    # (N, 3E) static sublane slice
            acc = jnp.zeros((N, E), jnp.float32)
            for h in range(H):                   # static loop, H is tiny
                # static lane slices of the qkv columns (no (N,H,D) reshape)
                q_h = qkv_b[:, 0 * E + h * D: 0 * E + (h + 1) * D]  # (N, D)
                k_h = qkv_b[:, 1 * E + h * D: 1 * E + (h + 1) * D]  # (N, D)
                v_h = qkv_b[:, 2 * E + h * D: 2 * E + (h + 1) * D]  # (N, D)

                # scores = q_h @ k_h^T on the MXU (scale already in q columns)
                s = lax.dot_general(q_h, k_h, (((1,), (1,)), ((), ())),
                                    preferred_element_type=jnp.float32)  # (N, N)

                # numerically-stable softmax in f32; EUP approx reciprocal
                m = jnp.max(s, axis=-1, keepdims=True)
                p = jnp.exp(s - m)
                att = p * pl.reciprocal(jnp.sum(p, axis=-1, keepdims=True),
                                        approx=True)

                o_h = jnp.dot(att, v_h,
                              preferred_element_type=jnp.float32)  # (N, D)

                # head-concat + output projection fused:
                #   out @ W_proj == sum_h o_h @ W_proj[h*D:(h+1)*D, :]
                acc = acc + jnp.dot(o_h.astype(w_proj.dtype),
                                    w_proj[h * D:(h + 1) * D, :],
                                    preferred_element_type=jnp.float32)
            proj_rows.append(acc)

        proj = proj_rows[0] if B == 1 else jnp.concatenate(proj_rows, axis=0)
        proj = proj + bproj_ref[...]             # (BN, E) + (1, E) broadcast
        o_ref[...] = proj.astype(o_ref.dtype)

    out2 = pl.pallas_call(
        kernel,
        out_shape=jax.ShapeDtypeStruct((BN, E), jnp.float32),
        grid_spec=pltpu.PrefetchScalarGridSpec(
            num_scalar_prefetch=0,
            grid=(1,),  # single invocation: problem is overhead-bound at this size
            in_specs=[
                pl.BlockSpec((BN, E), lambda i: (0, 0)),      # x (all rows)
                pl.BlockSpec((E, 3 * E), lambda i: (0, 0)),   # w_qkv (scaled)
                pl.BlockSpec((E, E), lambda i: (0, 0)),       # w_proj
                pl.BlockSpec((1, E), lambda i: (0, 0)),       # b_proj
            ],
            out_specs=pl.BlockSpec((BN, E), lambda i: (0, 0)),
        ),
        compiler_params=pltpu.CompilerParams(
            dimension_semantics=("arbitrary",)),
    )(x2, w_qkv_c, w_proj_c, b_proj_c)

    return out2.reshape(B, N, E).astype(x.dtype)


def reference_forward(x, w_qkv, w_proj, b_proj):
    """Pure-JAX reproduction of the PyTorch forward (eval mode, no mask),
    full-f32 precision.  Uses the *unscaled* qkv weight + explicit SCALE."""
    B, N, E = x.shape
    H, D = NUM_HEADS, HEAD_DIM
    hi = lax.Precision.HIGHEST
    qkv = jnp.dot(x, w_qkv, precision=hi)  # (B, N, 3E)
    q = qkv[..., 0 * E:1 * E].reshape(B, N, H, D).transpose(0, 2, 1, 3)
    k = qkv[..., 1 * E:2 * E].reshape(B, N, H, D).transpose(0, 2, 1, 3)
    v = qkv[..., 2 * E:3 * E].reshape(B, N, H, D).transpose(0, 2, 1, 3)
    energy = jnp.einsum('bhij,bhkj->bhik', q, k, precision=hi) * SCALE
    att = jax.nn.softmax(energy, axis=-1)
    out = jnp.einsum('bhij,bhjk->bhik', att, v, precision=hi)
    out = out.transpose(0, 2, 1, 3).reshape(B, N, E)
    return jnp.dot(out, w_proj, precision=hi) + b_proj


if __name__ == "__main__":
    key = jax.random.PRNGKey(0)
    kx, kqkv, kw, kb = jax.random.split(key, 4)

    x = jax.random.normal(kx, (BATCH, SEQ, EMBED_DIM), dtype=jnp.float32)
    # deterministic parameter init ((in, out) layout: y = x @ W + b)
    w_qkv = 0.02 * jax.random.normal(kqkv, (EMBED_DIM, 3 * EMBED_DIM), jnp.float32)
    w_proj = 0.02 * jax.random.normal(kw, (EMBED_DIM, EMBED_DIM), jnp.float32)
    b_proj = 0.02 * jax.random.normal(kb, (1, EMBED_DIM), jnp.float32)

    # one-time parameter preparation: fold SCALE into the q-block of w_qkv
    w_qkv_scaled = fold_scale_into_qkv(w_qkv)

    out = vit_attention_block(x, w_qkv_scaled, w_proj, b_proj)
    out = jax.block_until_ready(out)

    ref = reference_forward(x, w_qkv, w_proj, b_proj[0])
    assert out.shape == (BATCH, SEQ, EMBED_DIM)
    # bf16 MXU operands + approx reciprocal => loosened tolerance (precision, not a bug)
    assert jnp.allclose(out, ref, atol=5e-3, rtol=5e-2), "mismatch vs reference"

    print("KERNEL_OK")
</pallas_src>

<mosaic_0001>
module attributes {stable_mosaic.version = 11 : i64} {
  func.func @kernel(%arg0: i32, %arg1: memref<16x32xbf16, #tpu.memory_space<vmem>>, %arg2: memref<32x96xbf16, #tpu.memory_space<vmem>>, %arg3: memref<32x32xbf16, #tpu.memory_space<vmem>>, %arg4: memref<1x32xf32, #tpu.memory_space<vmem>>, %arg5: memref<16x32xf32, #tpu.memory_space<vmem>>) attributes {dimension_semantics = [#tpu.dimension_semantics<arbitrary>], iteration_bounds = array<i64: 1>, scalar_prefetch = 0 : i64, scratch_operands = 0 : i64, tpu.core_type = #tpu.core_type<tc>, window_params = [{pipeline_mode = #tpu.pipeline_mode<synchronous>, transform_indices = @transform_0, window_bounds = array<i64: 16, 32>}, {pipeline_mode = #tpu.pipeline_mode<synchronous>, transform_indices = @transform_1, window_bounds = array<i64: 32, 96>}, {pipeline_mode = #tpu.pipeline_mode<synchronous>, transform_indices = @transform_2, window_bounds = array<i64: 32, 32>}, {pipeline_mode = #tpu.pipeline_mode<synchronous>, transform_indices = @transform_3, window_bounds = array<i64: 1, 32>}, {pipeline_mode = #tpu.pipeline_mode<synchronous>, transform_indices = @transform_4, window_bounds = array<i64: 16, 32>}]} {
    %c0 = arith.constant 0 : index
    %c0_0 = arith.constant 0 : index
    %0 = vector.load %arg1[%c0, %c0_0] : memref<16x32xbf16, #tpu.memory_space<vmem>>, vector<16x32xbf16>
    %c0_1 = arith.constant 0 : index
    %c0_2 = arith.constant 0 : index
    %1 = vector.load %arg2[%c0_1, %c0_2] : memref<32x96xbf16, #tpu.memory_space<vmem>>, vector<32x96xbf16>
    %c0_3 = arith.constant 0 : index
    %c0_4 = arith.constant 0 : index
    %2 = vector.load %arg3[%c0_3, %c0_4] : memref<32x32xbf16, #tpu.memory_space<vmem>>, vector<32x32xbf16>
    %cst = arith.constant dense<0.000000e+00> : vector<16x96xf32>
    %3 = tpu.matmul %0, %1, %cst {dimension_numbers = #tpu.dot_dimension_numbers<[1], [0], [0], [1], [0, 0, 1, 1], [], []>} : vector<16x32xbf16>, vector<32x96xbf16>, vector<16x96xf32> -> vector<16x96xf32>
    %4 = vector.extract_strided_slice %3 {offsets = [0, 0], sizes = [8, 96], strides = [1, 1]} : vector<16x96xf32> to vector<8x96xf32>
    %cst_5 = arith.constant 0.000000e+00 : f32
    %5 = vector.broadcast %cst_5 : f32 to vector<8x32xf32>
    %6 = vector.extract_strided_slice %4 {offsets = [0, 0], sizes = [8, 8], strides = [1, 1]} : vector<8x96xf32> to vector<8x8xf32>
    %7 = vector.extract_strided_slice %4 {offsets = [0, 32], sizes = [8, 8], strides = [1, 1]} : vector<8x96xf32> to vector<8x8xf32>
    %8 = vector.extract_strided_slice %4 {offsets = [0, 64], sizes = [8, 8], strides = [1, 1]} : vector<8x96xf32> to vector<8x8xf32>
    %cst_6 = arith.constant dense<0.000000e+00> : vector<8x8xf32>
    %9 = tpu.matmul %6, %7, %cst_6 {dimension_numbers = #tpu.dot_dimension_numbers<[1], [1], [0], [0], [0, 0, 1, 0], [], []>} : vector<8x8xf32>, vector<8x8xf32>, vector<8x8xf32> -> vector<8x8xf32>
    %cst_7 = arith.constant dense<0xFF800000> : vector<8xf32>
    %10 = vector.multi_reduction <maximumf>, %9, %cst_7 [1] : vector<8x8xf32> to vector<8xf32>
    %11 = vector.shape_cast %10 : vector<8xf32> to vector<8x1xf32>
    %12 = vector.broadcast %11 : vector<8x1xf32> to vector<8x8xf32>
    %13 = arith.subf %9, %12 : vector<8x8xf32>
    %14 = math.exp %13 : vector<8x8xf32>
    %cst_8 = arith.constant dense<0.000000e+00> : vector<8xf32>
    %15 = vector.multi_reduction <add>, %14, %cst_8 [1] : vector<8x8xf32> to vector<8xf32>
    %16 = vector.shape_cast %15 : vector<8xf32> to vector<8x1xf32>
    %17 = tpu.reciprocal %16 {approx = true} : vector<8x1xf32> -> vector<8x1xf32>
    %18 = vector.broadcast %17 : vector<8x1xf32> to vector<8x8xf32>
    %19 = arith.mulf %14, %18 : vector<8x8xf32>
    %cst_9 = arith.constant dense<0.000000e+00> : vector<8x8xf32>
    %20 = tpu.matmul %19, %8, %cst_9 {dimension_numbers = #tpu.dot_dimension_numbers<[1], [0], [0], [1], [0, 0, 1, 1], [], []>} : vector<8x8xf32>, vector<8x8xf32>, vector<8x8xf32> -> vector<8x8xf32>
    %21 = arith.truncf %20 : vector<8x8xf32> to vector<8x8xbf16>
    %22 = vector.extract_strided_slice %2 {offsets = [0, 0], sizes = [8, 32], strides = [1, 1]} : vector<32x32xbf16> to vector<8x32xbf16>
    %cst_10 = arith.constant dense<0.000000e+00> : vector<8x32xf32>
    %23 = tpu.matmul %21, %22, %cst_10 {dimension_numbers = #tpu.dot_dimension_numbers<[1], [0], [0], [1], [0, 0, 1, 1], [], []>} : vector<8x8xbf16>, vector<8x32xbf16>, vector<8x32xf32> -> vector<8x32xf32>
    %24 = arith.addf %5, %23 : vector<8x32xf32>
    %25 = vector.extract_strided_slice %4 {offsets = [0, 8], sizes = [8, 8], strides = [1, 1]} : vector<8x96xf32> to vector<8x8xf32>
    %26 = vector.extract_strided_slice %4 {offsets = [0, 40], sizes = [8, 8], strides = [1, 1]} : vector<8x96xf32> to vector<8x8xf32>
    %27 = vector.extract_strided_slice %4 {offsets = [0, 72], sizes = [8, 8], strides = [1, 1]} : vector<8x96xf32> to vector<8x8xf32>
    %cst_11 = arith.constant dense<0.000000e+00> : vector<8x8xf32>
    %28 = tpu.matmul %25, %26, %cst_11 {dimension_numbers = #tpu.dot_dimension_numbers<[1], [1], [0], [0], [0, 0, 1, 0], [], []>} : vector<8x8xf32>, vector<8x8xf32>, vector<8x8xf32> -> vector<8x8xf32>
    %cst_12 = arith.constant dense<0xFF800000> : vector<8xf32>
    %29 = vector.multi_reduction <maximumf>, %28, %cst_12 [1] : vector<8x8xf32> to vector<8xf32>
    %30 = vector.shape_cast %29 : vector<8xf32> to vector<8x1xf32>
    %31 = vector.broadcast %30 : vector<8x1xf32> to vector<8x8xf32>
    %32 = arith.subf %28, %31 : vector<8x8xf32>
    %33 = math.exp %32 : vector<8x8xf32>
    %cst_13 = arith.constant dense<0.000000e+00> : vector<8xf32>
    %34 = vector.multi_reduction <add>, %33, %cst_13 [1] : vector<8x8xf32> to vector<8xf32>
    %35 = vector.shape_cast %34 : vector<8xf32> to vector<8x1xf32>
    %36 = tpu.reciprocal %35 {approx = true} : vector<8x1xf32> -> vector<8x1xf32>
    %37 = vector.broadcast %36 : vector<8x1xf32> to vector<8x8xf32>
    %38 = arith.mulf %33, %37 : vector<8x8xf32>
    %cst_14 = arith.constant dense<0.000000e+00> : vector<8x8xf32>
    %39 = tpu.matmul %38, %27, %cst_14 {dimension_numbers = #tpu.dot_dimension_numbers<[1], [0], [0], [1], [0, 0, 1, 1], [], []>} : vector<8x8xf32>, vector<8x8xf32>, vector<8x8xf32> -> vector<8x8xf32>
    %40 = arith.truncf %39 : vector<8x8xf32> to vector<8x8xbf16>
    %41 = vector.extract_strided_slice %2 {offsets = [8, 0], sizes = [8, 32], strides = [1, 1]} : vector<32x32xbf16> to vector<8x32xbf16>
    %cst_15 = arith.constant dense<0.000000e+00> : vector<8x32xf32>
    %42 = tpu.matmul %40, %41, %cst_15 {dimension_numbers = #tpu.dot_dimension_numbers<[1], [0], [0], [1], [0, 0, 1, 1], [], []>} : vector<8x8xbf16>, vector<8x32xbf16>, vector<8x32xf32> -> vector<8x32xf32>
    %43 = arith.addf %24, %42 : vector<8x32xf32>
    %44 = vector.extract_strided_slice %4 {offsets = [0, 16], sizes = [8, 8], strides = [1, 1]} : vector<8x96xf32> to vector<8x8xf32>
    %45 = vector.extract_strided_slice %4 {offsets = [0, 48], sizes = [8, 8], strides = [1, 1]} : vector<8x96xf32> to vector<8x8xf32>
    %46 = vector.extract_strided_slice %4 {offsets = [0, 80], sizes = [8, 8], strides = [1, 1]} : vector<8x96xf32> to vector<8x8xf32>
    %cst_16 = arith.constant dense<0.000000e+00> : vector<8x8xf32>
    %47 = tpu.matmul %44, %45, %cst_16 {dimension_numbers = #tpu.dot_dimension_numbers<[1], [1], [0], [0], [0, 0, 1, 0], [], []>} : vector<8x8xf32>, vector<8x8xf32>, vector<8x8xf32> -> vector<8x8xf32>
    %cst_17 = arith.constant dense<0xFF800000> : vector<8xf32>
    %48 = vector.multi_reduction <maximumf>, %47, %cst_17 [1] : vector<8x8xf32> to vector<8xf32>
    %49 = vector.shape_cast %48 : vector<8xf32> to vector<8x1xf32>
    %50 = vector.broadcast %49 : vector<8x1xf32> to vector<8x8xf32>
    %51 = arith.subf %47, %50 : vector<8x8xf32>
    %52 = math.exp %51 : vector<8x8xf32>
    %cst_18 = arith.constant dense<0.000000e+00> : vector<8xf32>
    %53 = vector.multi_reduction <add>, %52, %cst_18 [1] : vector<8x8xf32> to vector<8xf32>
    %54 = vector.shape_cast %53 : vector<8xf32> to vector<8x1xf32>
    %55 = tpu.reciprocal %54 {approx = true} : vector<8x1xf32> -> vector<8x1xf32>
    %56 = vector.broadcast %55 : vector<8x1xf32> to vector<8x8xf32>
    %57 = arith.mulf %52, %56 : vector<8x8xf32>
    %cst_19 = arith.constant dense<0.000000e+00> : vector<8x8xf32>
    %58 = tpu.matmul %57, %46, %cst_19 {dimension_numbers = #tpu.dot_dimension_numbers<[1], [0], [0], [1], [0, 0, 1, 1], [], []>} : vector<8x8xf32>, vector<8x8xf32>, vector<8x8xf32> -> vector<8x8xf32>
    %59 = arith.truncf %58 : vector<8x8xf32> to vector<8x8xbf16>
    %60 = vector.extract_strided_slice %2 {offsets = [16, 0], sizes = [8, 32], strides = [1, 1]} : vector<32x32xbf16> to vector<8x32xbf16>
    %cst_20 = arith.constant dense<0.000000e+00> : vector<8x32xf32>
    %61 = tpu.matmul %59, %60, %cst_20 {dimension_numbers = #tpu.dot_dimension_numbers<[1], [0], [0], [1], [0, 0, 1, 1], [], []>} : vector<8x8xbf16>, vector<8x32xbf16>, vector<8x32xf32> -> vector<8x32xf32>
    %62 = arith.addf %43, %61 : vector<8x32xf32>
    %63 = vector.extract_strided_slice %4 {offsets = [0, 24], sizes = [8, 8], strides = [1, 1]} : vector<8x96xf32> to vector<8x8xf32>
    %64 = vector.extract_strided_slice %4 {offsets = [0, 56], sizes = [8, 8], strides = [1, 1]} : vector<8x96xf32> to vector<8x8xf32>
    %65 = vector.extract_strided_slice %4 {offsets = [0, 88], sizes = [8, 8], strides = [1, 1]} : vector<8x96xf32> to vector<8x8xf32>
    %cst_21 = arith.constant dense<0.000000e+00> : vector<8x8xf32>
    %66 = tpu.matmul %63, %64, %cst_21 {dimension_numbers = #tpu.dot_dimension_numbers<[1], [1], [0], [0], [0, 0, 1, 0], [], []>} : vector<8x8xf32>, vector<8x8xf32>, vector<8x8xf32> -> vector<8x8xf32>
    %cst_22 = arith.constant dense<0xFF800000> : vector<8xf32>
    %67 = vector.multi_reduction <maximumf>, %66, %cst_22 [1] : vector<8x8xf32> to vector<8xf32>
    %68 = vector.shape_cast %67 : vector<8xf32> to vector<8x1xf32>
    %69 = vector.broadcast %68 : vector<8x1xf32> to vector<8x8xf32>
    %70 = arith.subf %66, %69 : vector<8x8xf32>
    %71 = math.exp %70 : vector<8x8xf32>
    %cst_23 = arith.constant dense<0.000000e+00> : vector<8xf32>
    %72 = vector.multi_reduction <add>, %71, %cst_23 [1] : vector<8x8xf32> to vector<8xf32>
    %73 = vector.shape_cast %72 : vector<8xf32> to vector<8x1xf32>
    %74 = tpu.reciprocal %73 {approx = true} : vector<8x1xf32> -> vector<8x1xf32>
    %75 = vector.broadcast %74 : vector<8x1xf32> to vector<8x8xf32>
    %76 = arith.mulf %71, %75 : vector<8x8xf32>
    %cst_24 = arith.constant dense<0.000000e+00> : vector<8x8xf32>
    %77 = tpu.matmul %76, %65, %cst_24 {dimension_numbers = #tpu.dot_dimension_numbers<[1], [0], [0], [1], [0, 0, 1, 1], [], []>} : vector<8x8xf32>, vector<8x8xf32>, vector<8x8xf32> -> vector<8x8xf32>
    %78 = arith.truncf %77 : vector<8x8xf32> to vector<8x8xbf16>
    %79 = vector.extract_strided_slice %2 {offsets = [24, 0], sizes = [8, 32], strides = [1, 1]} : vector<32x32xbf16> to vector<8x32xbf16>
    %cst_25 = arith.constant dense<0.000000e+00> : vector<8x32xf32>
    %80 = tpu.matmul %78, %79, %cst_25 {dimension_numbers = #tpu.dot_dimension_numbers<[1], [0], [0], [1], [0, 0, 1, 1], [], []>} : vector<8x8xbf16>, vector<8x32xbf16>, vector<8x32xf32> -> vector<8x32xf32>
    %81 = arith.addf %62, %80 : vector<8x32xf32>
    %82 = vector.extract_strided_slice %3 {offsets = [8, 0], sizes = [8, 96], strides = [1, 1]} : vector<16x96xf32> to vector<8x96xf32>
    %cst_26 = arith.constant 0.000000e+00 : f32
    %83 = vector.broadcast %cst_26 : f32 to vector<8x32xf32>
    %84 = vector.extract_strided_slice %82 {offsets = [0, 0], sizes = [8, 8], strides = [1, 1]} : vector<8x96xf32> to vector<8x8xf32>
    %85 = vector.extract_strided_slice %82 {offsets = [0, 32], sizes = [8, 8], strides = [1, 1]} : vector<8x96xf32> to vector<8x8xf32>
    %86 = vector.extract_strided_slice %82 {offsets = [0, 64], sizes = [8, 8], strides = [1, 1]} : vector<8x96xf32> to vector<8x8xf32>
    %cst_27 = arith.constant dense<0.000000e+00> : vector<8x8xf32>
    %87 = tpu.matmul %84, %85, %cst_27 {dimension_numbers = #tpu.dot_dimension_numbers<[1], [1], [0], [0], [0, 0, 1, 0], [], []>} : vector<8x8xf32>, vector<8x8xf32>, vector<8x8xf32> -> vector<8x8xf32>
    %cst_28 = arith.constant dense<0xFF800000> : vector<8xf32>
    %88 = vector.multi_reduction <maximumf>, %87, %cst_28 [1] : vector<8x8xf32> to vector<8xf32>
    %89 = vector.shape_cast %88 : vector<8xf32> to vector<8x1xf32>
    %90 = vector.broadcast %89 : vector<8x1xf32> to vector<8x8xf32>
    %91 = arith.subf %87, %90 : vector<8x8xf32>
    %92 = math.exp %91 : vector<8x8xf32>
    %cst_29 = arith.constant dense<0.000000e+00> : vector<8xf32>
    %93 = vector.multi_reduction <add>, %92, %cst_29 [1] : vector<8x8xf32> to vector<8xf32>
    %94 = vector.shape_cast %93 : vector<8xf32> to vector<8x1xf32>
    %95 = tpu.reciprocal %94 {approx = true} : vector<8x1xf32> -> vector<8x1xf32>
    %96 = vector.broadcast %95 : vector<8x1xf32> to vector<8x8xf32>
    %97 = arith.mulf %92, %96 : vector<8x8xf32>
    %cst_30 = arith.constant dense<0.000000e+00> : vector<8x8xf32>
    %98 = tpu.matmul %97, %86, %cst_30 {dimension_numbers = #tpu.dot_dimension_numbers<[1], [0], [0], [1], [0, 0, 1, 1], [], []>} : vector<8x8xf32>, vector<8x8xf32>, vector<8x8xf32> -> vector<8x8xf32>
    %99 = arith.truncf %98 : vector<8x8xf32> to vector<8x8xbf16>
    %100 = vector.extract_strided_slice %2 {offsets = [0, 0], sizes = [8, 32], strides = [1, 1]} : vector<32x32xbf16> to vector<8x32xbf16>
    %cst_31 = arith.constant dense<0.000000e+00> : vector<8x32xf32>
    %101 = tpu.matmul %99, %100, %cst_31 {dimension_numbers = #tpu.dot_dimension_numbers<[1], [0], [0], [1], [0, 0, 1, 1], [], []>} : vector<8x8xbf16>, vector<8x32xbf16>, vector<8x32xf32> -> vector<8x32xf32>
    %102 = arith.addf %83, %101 : vector<8x32xf32>
    %103 = vector.extract_strided_slice %82 {offsets = [0, 8], sizes = [8, 8], strides = [1, 1]} : vector<8x96xf32> to vector<8x8xf32>
    %104 = vector.extract_strided_slice %82 {offsets = [0, 40], sizes = [8, 8], strides = [1, 1]} : vector<8x96xf32> to vector<8x8xf32>
    %105 = vector.extract_strided_slice %82 {offsets = [0, 72], sizes = [8, 8], strides = [1, 1]} : vector<8x96xf32> to vector<8x8xf32>
    %cst_32 = arith.constant dense<0.000000e+00> : vector<8x8xf32>
    %106 = tpu.matmul %103, %104, %cst_32 {dimension_numbers = #tpu.dot_dimension_numbers<[1], [1], [0], [0], [0, 0, 1, 0], [], []>} : vector<8x8xf32>, vector<8x8xf32>, vector<8x8xf32> -> vector<8x8xf32>
    %cst_33 = arith.constant dense<0xFF800000> : vector<8xf32>
    %107 = vector.multi_reduction <maximumf>, %106, %cst_33 [1] : vector<8x8xf32> to vector<8xf32>
    %108 = vector.shape_cast %107 : vector<8xf32> to vector<8x1xf32>
    %109 = vector.broadcast %108 : vector<8x1xf32> to vector<8x8xf32>
    %110 = arith.subf %106, %109 : vector<8x8xf32>
    %111 = math.exp %110 : vector<8x8xf32>
    %cst_34 = arith.constant dense<0.000000e+00> : vector<8xf32>
    %112 = vector.multi_reduction <add>, %111, %cst_34 [1] : vector<8x8xf32> to vector<8xf32>
    %113 = vector.shape_cast %112 : vector<8xf32> to vector<8x1xf32>
    %114 = tpu.reciprocal %113 {approx = true} : vector<8x1xf32> -> vector<8x1xf32>
    %115 = vector.broadcast %114 : vector<8x1xf32> to vector<8x8xf32>
    %116 = arith.mulf %111, %115 : vector<8x8xf32>
    %cst_35 = arith.constant dense<0.000000e+00> : vector<8x8xf32>
    %117 = tpu.matmul %116, %105, %cst_35 {dimension_numbers = #tpu.dot_dimension_numbers<[1], [0], [0], [1], [0, 0, 1, 1], [], []>} : vector<8x8xf32>, vector<8x8xf32>, vector<8x8xf32> -> vector<8x8xf32>
    %118 = arith.truncf %117 : vector<8x8xf32> to vector<8x8xbf16>
    %119 = vector.extract_strided_slice %2 {offsets = [8, 0], sizes = [8, 32], strides = [1, 1]} : vector<32x32xbf16> to vector<8x32xbf16>
    %cst_36 = arith.constant dense<0.000000e+00> : vector<8x32xf32>
    %120 = tpu.matmul %118, %119, %cst_36 {dimension_numbers = #tpu.dot_dimension_numbers<[1], [0], [0], [1], [0, 0, 1, 1], [], []>} : vector<8x8xbf16>, vector<8x32xbf16>, vector<8x32xf32> -> vector<8x32xf32>
    %121 = arith.addf %102, %120 : vector<8x32xf32>
    %122 = vector.extract_strided_slice %82 {offsets = [0, 16], sizes = [8, 8], strides = [1, 1]} : vector<8x96xf32> to vector<8x8xf32>
    %123 = vector.extract_strided_slice %82 {offsets = [0, 48], sizes = [8, 8], strides = [1, 1]} : vector<8x96xf32> to vector<8x8xf32>
    %124 = vector.extract_strided_slice %82 {offsets = [0, 80], sizes = [8, 8], strides = [1, 1]} : vector<8x96xf32> to vector<8x8xf32>
    %cst_37 = arith.constant dense<0.000000e+00> : vector<8x8xf32>
    %125 = tpu.matmul %122, %123, %cst_37 {dimension_numbers = #tpu.dot_dimension_numbers<[1], [1], [0], [0], [0, 0, 1, 0], [], []>} : vector<8x8xf32>, vector<8x8xf32>, vector<8x8xf32> -> vector<8x8xf32>
    %cst_38 = arith.constant dense<0xFF800000> : vector<8xf32>
    %126 = vector.multi_reduction <maximumf>, %125, %cst_38 [1] : vector<8x8xf32> to vector<8xf32>
    %127 = vector.shape_cast %126 : vector<8xf32> to vector<8x1xf32>
    %128 = vector.broadcast %127 : vector<8x1xf32> to vector<8x8xf32>
    %129 = arith.subf %125, %128 : vector<8x8xf32>
    %130 = math.exp %129 : vector<8x8xf32>
    %cst_39 = arith.constant dense<0.000000e+00> : vector<8xf32>
    %131 = vector.multi_reduction <add>, %130, %cst_39 [1] : vector<8x8xf32> to vector<8xf32>
    %132 = vector.shape_cast %131 : vector<8xf32> to vector<8x1xf32>
    %133 = tpu.reciprocal %132 {approx = true} : vector<8x1xf32> -> vector<8x1xf32>
    %134 = vector.broadcast %133 : vector<8x1xf32> to vector<8x8xf32>
    %135 = arith.mulf %130, %134 : vector<8x8xf32>
    %cst_40 = arith.constant dense<0.000000e+00> : vector<8x8xf32>
    %136 = tpu.matmul %135, %124, %cst_40 {dimension_numbers = #tpu.dot_dimension_numbers<[1], [0], [0], [1], [0, 0, 1, 1], [], []>} : vector<8x8xf32>, vector<8x8xf32>, vector<8x8xf32> -> vector<8x8xf32>
    %137 = arith.truncf %136 : vector<8x8xf32> to vector<8x8xbf16>
    %138 = vector.extract_strided_slice %2 {offsets = [16, 0], sizes = [8, 32], strides = [1, 1]} : vector<32x32xbf16> to vector<8x32xbf16>
    %cst_41 = arith.constant dense<0.000000e+00> : vector<8x32xf32>
    %139 = tpu.matmul %137, %138, %cst_41 {dimension_numbers = #tpu.dot_dimension_numbers<[1], [0], [0], [1], [0, 0, 1, 1], [], []>} : vector<8x8xbf16>, vector<8x32xbf16>, vector<8x32xf32> -> vector<8x32xf32>
    %140 = arith.addf %121, %139 : vector<8x32xf32>
    %141 = vector.extract_strided_slice %82 {offsets = [0, 24], sizes = [8, 8], strides = [1, 1]} : vector<8x96xf32> to vector<8x8xf32>
    %142 = vector.extract_strided_slice %82 {offsets = [0, 56], sizes = [8, 8], strides = [1, 1]} : vector<8x96xf32> to vector<8x8xf32>
    %143 = vector.extract_strided_slice %82 {offsets = [0, 88], sizes = [8, 8], strides = [1, 1]} : vector<8x96xf32> to vector<8x8xf32>
    %cst_42 = arith.constant dense<0.000000e+00> : vector<8x8xf32>
    %144 = tpu.matmul %141, %142, %cst_42 {dimension_numbers = #tpu.dot_dimension_numbers<[1], [1], [0], [0], [0, 0, 1, 0], [], []>} : vector<8x8xf32>, vector<8x8xf32>, vector<8x8xf32> -> vector<8x8xf32>
    %cst_43 = arith.constant dense<0xFF800000> : vector<8xf32>
    %145 = vector.multi_reduction <maximumf>, %144, %cst_43 [1] : vector<8x8xf32> to vector<8xf32>
    %146 = vector.shape_cast %145 : vector<8xf32> to vector<8x1xf32>
    %147 = vector.broadcast %146 : vector<8x1xf32> to vector<8x8xf32>
    %148 = arith.subf %144, %147 : vector<8x8xf32>
    %149 = math.exp %148 : vector<8x8xf32>
    %cst_44 = arith.constant dense<0.000000e+00> : vector<8xf32>
    %150 = vector.multi_reduction <add>, %149, %cst_44 [1] : vector<8x8xf32> to vector<8xf32>
    %151 = vector.shape_cast %150 : vector<8xf32> to vector<8x1xf32>
    %152 = tpu.reciprocal %151 {approx = true} : vector<8x1xf32> -> vector<8x1xf32>
    %153 = vector.broadcast %152 : vector<8x1xf32> to vector<8x8xf32>
    %154 = arith.mulf %149, %153 : vector<8x8xf32>
    %cst_45 = arith.constant dense<0.000000e+00> : vector<8x8xf32>
    %155 = tpu.matmul %154, %143, %cst_45 {dimension_numbers = #tpu.dot_dimension_numbers<[1], [0], [0], [1], [0, 0, 1, 1], [], []>} : vector<8x8xf32>, vector<8x8xf32>, vector<8x8xf32> -> vector<8x8xf32>
    %156 = arith.truncf %155 : vector<8x8xf32> to vector<8x8xbf16>
    %157 = vector.extract_strided_slice %2 {offsets = [24, 0], sizes = [8, 32], strides = [1, 1]} : vector<32x32xbf16> to vector<8x32xbf16>
    %cst_46 = arith.constant dense<0.000000e+00> : vector<8x32xf32>
    %158 = tpu.matmul %156, %157, %cst_46 {dimension_numbers = #tpu.dot_dimension_numbers<[1], [0], [0], [1], [0, 0, 1, 1], [], []>} : vector<8x8xbf16>, vector<8x32xbf16>, vector<8x32xf32> -> vector<8x32xf32>
    %159 = arith.addf %140, %158 : vector<8x32xf32>
    %160 = tpu.concatenate %81, %159 in 0 : vector<8x32xf32>, vector<8x32xf32> -> vector<16x32xf32>
    %c0_47 = arith.constant 0 : index
    %c0_48 = arith.constant 0 : index
    %161 = vector.load %arg4[%c0_47, %c0_48] : memref<1x32xf32, #tpu.memory_space<vmem>>, vector<1x32xf32>
    %162 = vector.broadcast %161 : vector<1x32xf32> to vector<16x32xf32>
    %163 = arith.addf %160, %162 : vector<16x32xf32>
    %c0_49 = arith.constant 0 : index
    %c0_50 = arith.constant 0 : index
    %164 = vector.load %arg5[%c0_49, %c0_50] : memref<16x32xf32, #tpu.memory_space<vmem>>, vector<16x32xf32>
    tpu.vector_store %arg5[%c0_49, %c0_50], %163 {strides = array<i32>} : memref<16x32xf32, #tpu.memory_space<vmem>>, vector<16x32xf32>,
    return
  }
  func.func @transform_0(%arg0: i32) -> (i32, i32) {
    %c0_i32 = arith.constant 0 : i32
    %c0_i32_0 = arith.constant 0 : i32
    %c0_i32_1 = arith.constant 0 : i32
    return %c0_i32, %c0_i32_0 : i32, i32
  }
  func.func @transform_1(%arg0: i32) -> (i32, i32) {
    %c0_i32 = arith.constant 0 : i32
    %c0_i32_0 = arith.constant 0 : i32
    %c0_i32_1 = arith.constant 0 : i32
    return %c0_i32, %c0_i32_0 : i32, i32
  }
  func.func @transform_2(%arg0: i32) -> (i32, i32) {
    %c0_i32 = arith.constant 0 : i32
    %c0_i32_0 = arith.constant 0 : i32
    %c0_i32_1 = arith.constant 0 : i32
    return %c0_i32, %c0_i32_0 : i32, i32
  }
  func.func @transform_3(%arg0: i32) -> (i32, i32) {
    %c0_i32 = arith.constant 0 : i32
    %c0_i32_0 = arith.constant 0 : i32
    %c0_i32_1 = arith.constant 0 : i32
    return %c0_i32, %c0_i32_0 : i32, i32
  }
  func.func @transform_4(%arg0: i32) -> (i32, i32) {
    %c0_i32 = arith.constant 0 : i32
    %c0_i32_0 = arith.constant 0 : i32
    %c0_i32_1 = arith.constant 0 : i32
    return %c0_i32, %c0_i32_0 : i32, i32
  }
}

</mosaic_0001>

<bundles_post_ra>
// kernel: tpu_custom_call.1
= control target key start
LH: loop header
LB: loop body
LE: loop exit
PB: predicated region body
PF: predicated region fallthrough
CT: control target
= control target key end

     0   :  { %9 = vsyncpa [#allocation3], 0  ;;  %s2484_s0 = inlined_call_operand.hbm [shape: bf16[16,32], index: 0, kind: input, shape index: {}]   ;;  %s2485_s1 = inlined_call_operand.hbm [shape: bf16[32,96], index: 1, kind: input, shape index: {}]   ;;  %s2486_s2 = inlined_call_operand.hbm [shape: bf16[32,32], index: 2, kind: input, shape index: {}]   ;;  %s2487_s3 = inlined_call_operand.vmem [shape: f32[1,32], index: 3, kind: input, shape index: {}]   ;;  %s2488_s4 = inlined_call_operand.hbm [shape: f32[16,32], index: 4, kind: output, shape index: {}]  }
   0x1   :  { %10 = vsyncpa [#allocation6], 0 }
   0x2   :  { %11 = vsyncpa [#allocation4], 0  ;;  %s2214_s15 = smov [#allocation5]   ;;  %s2215_s17 = smov [#allocation2]  }
   0x3   :  { %s29_s16 = sshll.u32 %s2214_s15, 4  ;;  %s17_s18 = sshll.u32 %s2215_s17, 4  ;;  %s30_s16 = int_to_ptr.vmem [resolvable:$true] %s29_s16  ;;  %s18_s18 = int_to_ptr.vmem [resolvable:$true] %s17_s18 }
   0x4   :  { %s2136_s19 = scalar_lea.vmem %s30_s16, 256  ;;  %p2141_p1 = scmp.lt.s32.totalorder %s30_s16, %s30_s16 }
   0x5   :  { %p2137_p0 = scmp.ne.s32.totalorder %s30_s16, %s2136_s19  ;;  %p2142_p2 = scmp.lt.s32.totalorder %s2136_s19, %s2136_s19 }
   0x7   :  { %p2143_p3 = por %p2142_p2, %p2141_p1 }
   0x9   :  { %p2144_p4 = pnand %p2143_p3, %p2137_p0 }
   0xb   :  { %2147 = shalt.err (!%p2144_p4)
}
   0xc   :  { %s2216_s20 = smov 64   ;;  %s2217_s21 = smov 4  }
   0xd   :  { %35 = dma.hbm_to_vmem [thread:$0]  %s2485_s1, 256, %s30_s16, [#allocation6], %s2216_s20, %s2216_s20, %s2217_s21  }
   0xe   :  { %s2156_s24 = scalar_lea.vmem %s18_s18, 128  ;;  %p2161_p6 = scmp.lt.s32.totalorder %s18_s18, %s18_s18 }
   0xf   :  { %p2157_p5 = scmp.ne.s32.totalorder %s18_s18, %s2156_s24  ;;  %p2162_p7 = scmp.lt.s32.totalorder %s2156_s24, %s2156_s24 }
  0x11   :  { %p2163_p8 = por %p2162_p7, %p2161_p6 }
  0x13   :  { %p2164_p9 = pnand %p2163_p8, %p2157_p5 }
  0x15   :  { %2167 = shalt.err (!%p2164_p9)
}
  0x16   :  { %23 = dma.hbm_to_vmem [thread:$0]  %s2484_s0, 128, %s18_s18, [#allocation3], %s2216_s20, %s2216_s20, %s2217_s21  }
  0x17   :  { %s2218_s27 = smov [#allocation7]  }
  0x18   :  { %s41_s28 = sshll.u32 %s2218_s27, 4  ;;  %s42_s28 = int_to_ptr.vmem [resolvable:$true] %s41_s28 }
  0x19   :  { %s2176_s29 = scalar_lea.vmem %s42_s28, 256  ;;  %p2181_p11 = scmp.lt.s32.totalorder %s42_s28, %s42_s28 }
  0x1a   :  { %p2177_p10 = scmp.ne.s32.totalorder %s42_s28, %s2176_s29  ;;  %p2182_p12 = scmp.lt.s32.totalorder %s2176_s29, %s2176_s29 }
  0x1c   :  { %p2183_p13 = por %p2182_p12, %p2181_p11 }
  0x1e   :  { %p2184_p0 = pnand %p2183_p13, %p2177_p10 }
  0x20   :  { %2187 = shalt.err (!%p2184_p0)
}
  0x21   :  { %47 = dma.hbm_to_vmem [thread:$0]  %s2486_s2, 256, %s42_s28, [#allocation6], %s2216_s20, %s2216_s20, %s2217_s21  }
  0x22   :  { %2208 = dma.done.wait [#allocation3], 128  }
  0x23   :  { %2209 = vsyncadd [#allocation3], 4294967168 }
  0x24   :  { %2210 = dma.done.wait [#allocation6], 512  }
  0x25   :  { %2211 = vsyncadd [#allocation6], 4294966784  ;;  %v2219_v0 = vmov 0.0   ;;  %vm2220_vm0 = vmmov 0   ;;  %v2093_v1 = vld [vmem:[#allocation5 + $0x8] sm:$0xff]   ;;  %v2094_v2 = vld [vmem:[#allocation5] sm:$0xff]  }
  0x26   :  { %1937 = vmatprep.subr.bf16.mxu0 %v2219_v0  ;;  %1941 = vmatprep.mubr.msk.bf16.mxu0 %vm2220_vm0, %v2219_v0  ;;  %v2095_v3 = vld [vmem:[#allocation2] sm:$0xff]   ;;  %vm87_vm1 = vcmask 261120   ;;  %s2221_s0 = smov 96   ;;  %s2222_s2 = smov 88   ;;  %vm135_vm2 = vcmask 64512   ;;  %vm467_vm3 = vcmask 1043456  }
  0x27   :  { %1945 = vmatprep.subr.mxu1 %v2219_v0  ;;  %1947 = vmatprep.mubr.msk.f32.mxu1 %vm2220_vm0, %v2219_v0  ;;  %s2223_s5 = smov 120   ;;  %s2224_s6 = smov 56   ;;  %v67_v33 = vld [vmem:[#allocation7 + $0x4] sm:$0xf]  ;;  %v66_v37 = vld [vmem:[#allocation7] sm:$0xf] }
  0x28   :  { %1938 = vmatpush3.bf16.msra.mxu0 %v2093_v1  ;;  %s2225_s7 = smov 80   ;;  %s2226_s8 = smov 112   ;;  %v2323_v34 = vsel %vm467_vm3, %v67_v33, 0  ;;  %v2329_v40 = vsel %vm467_vm3, %v66_v37, 0 }
  0x29   :  { %1939 = vmatprep.subr.bf16.mxu0 %v2219_v0  ;;  %s2227_s9 = smov 48   ;;  %s2228_s10 = smov 72  }
  0x2a   :  { %s2229_s11 = smov 104   ;;  %s2230_s12 = smov 40  }
  0x2c   :  { %1940 = vmatpush3.bf16.msra.mxu0 %v2094_v2 }
  0x2d   :  { %1960 = vmatprep.subr.mxu0 %v2219_v0 }
  0x2f   :  { %1942 = vmatmul.mubr.msk.bf16.vlgmr.msra.gmra.mxu0 %vm87_vm1, %v2095_v3 }
  0x30   :  { %1962 = vmatprep.mubr.msk.f32.mxu0 %vm2220_vm0, %v2219_v0 }
  0xef   :  { %v2285_v4 = vpop.f32.mrf.mxu0 }
  0xf0   :  { %221 = vrot.lane.b32.xlu1 %v2285_v4, %s2216_s20  ;;  %133 = vrot.lane.b32.xlu0 %v2285_v4, %s2221_s0 }
  0xf1   :  { %v1943_v5 = vpop.f32.mrf.mxu0 }
  0xf3   :  { %v2291_v6 = vpop.f32.mrf.mxu0 }
  0xf4   :  { %300 = vrot.lane.b32.xlu1 %v2285_v4, %s2222_s2 }
  0xf5   :  { %v1944_v7 = vpop.f32.mrf.mxu0 }
 0x162   :  { %v134_v8 = vpop.permute.xlu0 %133  ;;  %v222_v9 = vpop.permute.xlu1 %221 }
 0x163   :  { %1946 = vmatpush3.xpose.msk.msra.mxu1 %vm135_vm2, %v134_v8  ;;  %v68_v8 = vld [vmem:[#allocation7 + $0x8] sm:$0xf] }
 0x164   :  { %1950 = vmatprep.subr.mxu1 %v2219_v0 }
 0x166   :  { %1948 = vmatmul.mubr.msk.f32.vlgmr.msra.gmra.mxu1 %vm135_vm2, %v2285_v4  ;;  %v301_v18 = vpop.permute.xlu1 %300 }
 0x167   :  { %1951 = vmatpush3.msra.mxu1 %v222_v9  ;;  %1952 = vmatprep.mubr.msk.f32.mxu1 %vm2220_vm0, %v2219_v0  ;;  %v2367_v9 = vsel %vm467_vm3, %v68_v8, 0 }
 0x168   :  { %1955 = vmatprep.subr.mxu1 %v2219_v0 }
 0x226   :  { %v206_v10 = vpop.f32.mrf.mxu1 }
 0x227   :  { %v210_v11 = vsel %vm135_vm2, %v206_v10, -inf }
 0x228   :  { %211 = vmax.xlane.f32.xlu0 %v210_v11  ;;  %v1949_v12 = vpop.f32.mrf.mxu1 }
 0x2b1   :  { %v212_v13 = vpop.xlane.xlu0 %211 }
 0x2b2   :  { %v213_v14 = vsub.f32 %v206_v10, %v212_v13 }
 0x2b4   :  { %v214_v15 = vmul.f32 1.442695, %v213_v14 }
 0x2b6   :  { %2096 = vpow2.f32 %v214_v15 }
 0x2c3   :  { %v2097_v16 = vpop.eup %2096 }
 0x2c4   :  { %v216_v17 = vsel %vm135_vm2, %v2097_v16, 0.0 }
 0x2c5   :  { %217 = vadd.xlane.f32.xlu1 %v216_v17 }
 0x2d6   :  { %298 = vrot.lane.b32.xlu1 %v2285_v4, %s2223_s5 }
 0x34e   :  { %v218_v19 = vpop.xlane.xlu1 %217 }
 0x34f   :  { %2098 = vrcp.f32 %v218_v19 }
 0x352   :  { %v299_v22 = vpop.permute.xlu1 %298 }
 0x35c   :  { %v2099_v20 = vpop.eup %2098 }
 0x35d   :  { %v220_v21 = vmul.f32 %v2099_v20, %v2097_v16 }
 0x35f   :  { %1953 = vmatmul.mubr.msk.f32.vlgmr.msra.gmra.mxu1 %vm135_vm2, %v220_v21  ;;  %v69_v21 = vld [vmem:[#allocation7 + $0xc] sm:$0xf] }
 0x360   :  { %1956 = vmatpush3.xpose.msk.msra.mxu1 %vm135_vm2, %v301_v18  ;;  %1957 = vmatprep.mubr.msk.f32.mxu1 %vm2220_vm0, %v2219_v0 }
 0x361   :  { %1965 = vmatprep.subr.bf16.mxu1 %v2219_v0 }
 0x363   :  { %1958 = vmatmul.mubr.msk.f32.vlgmr.msra.gmra.mxu1 %vm135_vm2, %v299_v22 }
 0x364   :  { %1967 = vmatprep.mubr.msk.bf16.mxu1 %vm2220_vm0, %v2219_v0  ;;  %1966 = vmatpush3.bf16.msra.mxu1 %v2323_v34 }
 0x365   :  { %1977 = vmatprep.subr.mxu1 %v2219_v0 }
 0x41f   :  { %v293_v23 = vpop.f32.mrf.mxu1 }
 0x420   :  { %v297_v41 = vpack.c.bf16 %v293_v23, %v293_v23  ;;  %v2386_v23 = vsel %vm467_vm3, %v69_v21, 0 }
 0x421   :  { %v1954_v24 = vpop.f32.mrf.mxu1 }
 0x423   :  { %v372_v25 = vpop.f32.mrf.mxu1 }
 0x424   :  { %v376_v26 = vsel %vm135_vm2, %v372_v25, -inf }
 0x425   :  { %377 = vmax.xlane.f32.xlu1 %v376_v26  ;;  %v1959_v27 = vpop.f32.mrf.mxu1 }
 0x4ae   :  { %v378_v28 = vpop.xlane.xlu1 %377 }
 0x4af   :  { %v379_v29 = vsub.f32 %v372_v25, %v378_v28 }
 0x4b1   :  { %v380_v30 = vmul.f32 1.442695, %v379_v29 }
 0x4b3   :  { %2100 = vpow2.f32 %v380_v30 }
 0x4c0   :  { %v2101_v31 = vpop.eup %2100 }
 0x4c1   :  { %v382_v32 = vsel %vm135_vm2, %v2101_v31, 0.0 }
 0x4c2   :  { %383 = vadd.xlane.f32.xlu0 %v382_v32 }
 0x4d8   :  { %387 = vrot.lane.b32.xlu0 %v2285_v4, %s2224_s6 }
 0x4dc   :  { %559 = vrot.lane.b32.xlu0 %v2285_v4, %s2225_s7 }
 0x4e0   :  { %557 = vrot.lane.b32.xlu0 %v2285_v4, %s2226_s8 }
 0x54b   :  { %v384_v35 = vpop.xlane.xlu0 %383 }
 0x54c   :  { %2102 = vrcp.f32 %v384_v35 }
 0x54f   :  { %v388_v36 = vpop.permute.xlu0 %387 }
 0x550   :  { %1961 = vmatpush3.msra.mxu0 %v388_v36 }
 0x551   :  { %1971 = vmatprep.subr.bf16.mxu0 %v2219_v0 }
 0x553   :  { %v560_v45 = vpop.permute.xlu0 %559 }
 0x557   :  { %v558_v49 = vpop.permute.xlu0 %557 }
 0x559   :  { %v2103_v38 = vpop.eup %2102 }
 0x55a   :  { %v386_v39 = vmul.f32 %v2103_v38, %v2101_v31 }
 0x55c   :  { %1963 = vmatmul.mubr.msk.f32.vlgmr.msra.gmra.mxu0 %vm135_vm2, %v386_v39 }
 0x55d   :  { %1972 = vmatpush3.bf16.msra.mxu0 %v2329_v40  ;;  %1973 = vmatprep.mubr.msk.bf16.mxu0 %vm2220_vm0, %v2219_v0 }
 0x55e   :  { %1982 = vmatprep.subr.mxu0 %v2219_v0 }
 0x560   :  { %1974 = vmatmul.mubr.msk.bf16.vlgmr.msra.gmra.mxu0 %vm135_vm2, %v297_v41 }
 0x561   :  { %1984 = vmatprep.mubr.msk.f32.mxu0 %vm2220_vm0, %v2219_v0 }
 0x61c   :  { %v459_v42 = vpop.f32.mrf.mxu0 }
 0x61d   :  { %v463_v43 = vpack.c.bf16 %v459_v42, %v459_v42 }
 0x61e   :  { %v1964_v44 = vpop.f32.mrf.mxu0 }
 0x61f   :  { %1968 = vmatmul.mubr.msk.bf16.vlgmr.msra.gmra.mxu1 %vm135_vm2, %v463_v43 }
 0x620   :  { %1978 = vmatpush3.xpose.msk.msra.mxu1 %vm135_vm2, %v560_v45  ;;  %v2341_v46 = vpop.f32.mrf.mxu0  ;;  %1979 = vmatprep.mubr.msk.f32.mxu1 %vm2220_vm0, %v2219_v0 }
 0x621   :  { %1987 = vmatprep.subr.bf16.mxu1 %v2219_v0 }
 0x622   :  { %v1975_v47 = vpop.f32.mrf.mxu0 }
 0x624   :  { %v554_v48 = vpop.f32.mrf.mxu0 }
 0x626   :  { %v1976_v50 = vpop.f32.mrf.mxu0 }
 0x627   :  { %1980 = vmatmul.mubr.msk.f32.vlgmr.msra.gmra.mxu1 %vm135_vm2, %v558_v49  ;;  %v2415_v49 = vld [vmem:[%s2487_s3] ss:$0 sm:$0xff]  ;;  %s2231_s3 = smov [#allocation8]  }
 0x628   :  { %1989 = vmatprep.mubr.msk.bf16.mxu1 %vm2220_vm0, %v2219_v0  ;;  %1988 = vmatpush3.bf16.msra.mxu1 %v2367_v9  ;;  %s1836_s15 = sshll.u32 %s2231_s3, 4  ;;  %s1837_s15 = int_to_ptr.vmem [resolvable:$true] %s1836_s15 }
 0x629   :  { %2003 = vmatprep.subr.bf16.mxu1 %v2219_v0  ;;  %s2188_s16 = scalar_lea.vmem %s1837_s15, 256  ;;  %p2193_p2 = scmp.lt.s32.totalorder %s1837_s15, %s1837_s15 }
 0x62a   :  { %p2189_p1 = scmp.ne.s32.totalorder %s1837_s15, %s2188_s16  ;;  %p2194_p3 = scmp.lt.s32.totalorder %s2188_s16, %s2188_s16 }
 0x62c   :  { %p2195_p4 = por %p2194_p3, %p2193_p2 }
 0x62e   :  { %p2196_p5 = pnand %p2195_p4, %p2189_p1 }
 0x6df   :  { %v505_v51 = vpop.f32.mrf.mxu1 }
 0x6e0   :  { %v552_v22 = vadd.f32 %v2341_v46, %v505_v51 }
 0x6e1   :  { %v1969_v52 = vpop.f32.mrf.mxu1 }
 0x6e3   :  { %v508_v53 = vpop.f32.mrf.mxu1 }
 0x6e5   :  { %v1970_v54 = vpop.f32.mrf.mxu1 }
 0x6e7   :  { %v631_v55 = vpop.f32.mrf.mxu1 }
 0x6e8   :  { %v635_v56 = vsel %vm135_vm2, %v631_v55, -inf }
 0x6e9   :  { %636 = vmax.xlane.f32.xlu1 %v635_v56  ;;  %v1981_v57 = vpop.f32.mrf.mxu1 }
 0x6fa   :  { %646 = vrot.lane.b32.xlu1 %v2285_v4, %s2227_s9 }
 0x6fe   :  { %772 = vrot.lane.b32.xlu1 %v2285_v4, %s2228_s10 }
 0x702   :  { %770 = vrot.lane.b32.xlu1 %v2285_v4, %s2229_s11 }
 0x772   :  { %v637_v58 = vpop.xlane.xlu1 %636 }
 0x773   :  { %v638_v59 = vsub.f32 %v631_v55, %v637_v58 }
 0x775   :  { %v639_v60 = vmul.f32 1.442695, %v638_v59 }
 0x776   :  { %v647_v61 = vpop.permute.xlu1 %646 }
 0x777   :  { %2104 = vpow2.f32 %v639_v60  ;;  %1983 = vmatpush3.msra.mxu0 %v647_v61 }
 0x778   :  { %1993 = vmatprep.subr.mxu0 %v2219_v0 }
 0x77a   :  { %v773_v3 = vpop.permute.xlu1 %772 }
 0x77e   :  { %v771_v7 = vpop.permute.xlu1 %770 }
 0x784   :  { %v2105_v62 = vpop.eup %2104 }
 0x785   :  { %v641_v63 = vsel %vm135_vm2, %v2105_v62, 0.0 }
 0x786   :  { %642 = vadd.xlane.f32.xlu0 %v641_v63 }
 0x80f   :  { %v643_v1 = vpop.xlane.xlu0 %642 }
 0x810   :  { %2106 = vrcp.f32 %v643_v1 }
 0x81d   :  { %v2107_v2 = vpop.eup %2106 }
 0x81e   :  { %v645_v5 = vmul.f32 %v2107_v2, %v2105_v62 }
 0x820   :  { %1985 = vmatmul.mubr.msk.f32.vlgmr.msra.gmra.mxu0 %vm135_vm2, %v645_v5 }
 0x821   :  { %1994 = vmatpush3.xpose.msk.msra.mxu0 %vm135_vm2, %v773_v3  ;;  %1995 = vmatprep.mubr.msk.f32.mxu0 %vm2220_vm0, %v2219_v0 }
 0x822   :  { %1998 = vmatprep.subr.mxu0 %v2219_v0 }
 0x824   :  { %1996 = vmatmul.mubr.msk.f32.vlgmr.msra.gmra.mxu0 %vm135_vm2, %v771_v7 }
 0x825   :  { %2000 = vmatprep.mubr.msk.f32.mxu0 %vm2220_vm0, %v2219_v0 }
 0x8e0   :  { %v718_v10 = vpop.f32.mrf.mxu0 }
 0x8e1   :  { %v722_v11 = vpack.c.bf16 %v718_v10, %v718_v10 }
 0x8e2   :  { %v1986_v12 = vpop.f32.mrf.mxu0 }
 0x8e3   :  { %1990 = vmatmul.mubr.msk.bf16.vlgmr.msra.gmra.mxu1 %vm135_vm2, %v722_v11 }
 0x8e4   :  { %v844_v13 = vpop.f32.mrf.mxu0  ;;  %2005 = vmatprep.mubr.msk.bf16.mxu1 %vm2220_vm0, %v2219_v0  ;;  %2004 = vmatpush3.bf16.msra.mxu1 %v2386_v23 }
 0x8e5   :  { %v848_v14 = vsel %vm135_vm2, %v844_v13, -inf  ;;  %2019 = vmatprep.subr.mxu1 %v2219_v0 }
 0x8e6   :  { %849 = vmax.xlane.f32.xlu1 %v848_v14  ;;  %v1997_v15 = vpop.f32.mrf.mxu0 }
 0x8f7   :  { %1148 = vrot.lane.b32.xlu1 %v2291_v6, %s2223_s5 }
 0x96f   :  { %v850_v16 = vpop.xlane.xlu1 %849 }
 0x970   :  { %v851_v17 = vsub.f32 %v844_v13, %v850_v16 }
 0x972   :  { %v852_v18 = vmul.f32 1.442695, %v851_v17 }
 0x973   :  { %v1149_v42 = vpop.permute.xlu1 %1148 }
 0x974   :  { %2108 = vpow2.f32 %v852_v18 }
 0x981   :  { %v2109_v19 = vpop.eup %2108 }
 0x982   :  { %v854_v20 = vsel %vm135_vm2, %v2109_v19, 0.0 }
 0x983   :  { %855 = vadd.xlane.f32.xlu0 %v854_v20 }
 0x999   :  { %859 = vrot.lane.b32.xlu0 %v2285_v4, %s2230_s12 }
 0x99d   :  { %984 = vrot.lane.b32.xlu0 %v2291_v6, %s2221_s0 }
 0x9a1   :  { %1150 = vrot.lane.b32.xlu0 %v2291_v6, %s2222_s2 }
 0x9a3   :  { %v763_v24 = vpop.f32.mrf.mxu1 }
 0x9a4   :  { %v769_v25 = vadd.f32 %v763_v24, %v552_v22 }
 0x9a5   :  { %v1991_v26 = vpop.f32.mrf.mxu1 }
 0x9a7   :  { %v766_v4 = vpop.f32.mrf.mxu1 }
 0x9a9   :  { %v1992_v27 = vpop.f32.mrf.mxu1 }
 0xa0c   :  { %v856_v28 = vpop.xlane.xlu0 %855 }
 0xa0d   :  { %2110 = vrcp.f32 %v856_v28 }
 0xa10   :  { %v860_v29 = vpop.permute.xlu0 %859 }
 0xa11   :  { %1999 = vmatpush3.msra.mxu0 %v860_v29 }
 0xa12   :  { %2009 = vmatprep.subr.mxu0 %v2219_v0 }
 0xa14   :  { %v985_v32 = vpop.permute.xlu0 %984 }
 0xa18   :  { %v1151_v37 = vpop.permute.xlu0 %1150 }
 0xa1a   :  { %v2111_v30 = vpop.eup %2110 }
 0xa1b   :  { %v858_v31 = vmul.f32 %v2111_v30, %v2109_v19 }
 0xa1d   :  { %2001 = vmatmul.mubr.msk.f32.vlgmr.msra.gmra.mxu0 %vm135_vm2, %v858_v31 }
 0xa1e   :  { %2010 = vmatpush3.xpose.msk.msra.mxu0 %vm135_vm2, %v985_v32  ;;  %2011 = vmatprep.mubr.msk.f32.mxu0 %vm2220_vm0, %v2219_v0 }
 0xa1f   :  { %2014 = vmatprep.subr.mxu0 %v2219_v0 }
 0xa21   :  { %2012 = vmatmul.mubr.msk.f32.vlgmr.msra.gmra.mxu0 %vm135_vm2, %v2291_v6 }
 0xa22   :  { %2016 = vmatprep.mubr.msk.f32.mxu0 %vm2220_vm0, %v2219_v0 }
 0xadd   :  { %v931_v33 = vpop.f32.mrf.mxu0 }
 0xade   :  { %v935_v35 = vpack.c.bf16 %v931_v33, %v931_v33 }
 0xadf   :  { %v2002_v36 = vpop.f32.mrf.mxu0 }
 0xae0   :  { %2006 = vmatmul.mubr.msk.bf16.vlgmr.msra.gmra.mxu1 %vm135_vm2, %v935_v35 }
 0xae1   :  { %2020 = vmatpush3.xpose.msk.msra.mxu1 %vm135_vm2, %v1151_v37  ;;  %v1056_v38 = vpop.f32.mrf.mxu0  ;;  %2021 = vmatprep.mubr.msk.f32.mxu1 %vm2220_vm0, %v2219_v0 }
 0xae2   :  { %v1060_v39 = vsel %vm135_vm2, %v1056_v38, -inf  ;;  %2029 = vmatprep.subr.bf16.mxu1 %v2219_v0 }
 0xae3   :  { %1061 = vmax.xlane.f32.xlu0 %v1060_v39  ;;  %v2013_v41 = vpop.f32.mrf.mxu0 }
 0xae8   :  { %2022 = vmatmul.mubr.msk.f32.vlgmr.msra.gmra.mxu1 %vm135_vm2, %v1149_v42 }
 0xae9   :  { %2030 = vmatpush3.bf16.msra.mxu1 %v2323_v34  ;;  %2031 = vmatprep.mubr.msk.bf16.mxu1 %vm2220_vm0, %v2219_v0 }
 0xaea   :  { %2041 = vmatprep.subr.mxu1 %v2219_v0 }
 0xb6c   :  { %v1062_v43 = vpop.xlane.xlu0 %1061 }
 0xb6d   :  { %v1063_v44 = vsub.f32 %v1056_v38, %v1062_v43 }
 0xb6f   :  { %v1064_v45 = vmul.f32 1.442695, %v1063_v44 }
 0xb71   :  { %2112 = vpow2.f32 %v1064_v45 }
 0xb7e   :  { %v2113_v46 = vpop.eup %2112 }
 0xb7f   :  { %v1066_v47 = vsel %vm135_vm2, %v2113_v46, 0.0 }
 0xb80   :  { %1067 = vadd.xlane.f32.xlu0 %v1066_v47 }
 0xba0   :  { %v976_v48 = vpop.f32.mrf.mxu1 }
 0xba1   :  { %v982_v34 = vadd.f32 %v976_v48, %v769_v25 }
 0xba2   :  { %v2007_v50 = vpop.f32.mrf.mxu1 }
 0xba3   :  { %v1827_v51 = vadd.f32 %v2415_v49, %v982_v34 }
 0xba4   :  { %v979_v52 = vpop.f32.mrf.mxu1 }
 0xba5   :  { %1829 = vst.msk [vmem:[#allocation8] sm:$0xff] %vm87_vm1, %v1827_v51 }
 0xba6   :  { %v2008_v53 = vpop.f32.mrf.mxu1 }
 0xba8   :  { %v1222_v54 = vpop.f32.mrf.mxu1 }
 0xba9   :  { %v1226_v55 = vsel %vm135_vm2, %v1222_v54, -inf }
 0xbaa   :  { %1227 = vmax.xlane.f32.xlu1 %v1226_v55  ;;  %v2023_v56 = vpop.f32.mrf.mxu1 }
 0xbbb   :  { %1237 = vrot.lane.b32.xlu1 %v2291_v6, %s2224_s6 }
 0xc09   :  { %v1068_v62 = vpop.xlane.xlu0 %1067 }
 0xc33   :  { %v1228_v57 = vpop.xlane.xlu1 %1227 }
 0xc34   :  { %v1229_v58 = vsub.f32 %v1222_v54, %v1228_v57 }
 0xc36   :  { %v1230_v59 = vmul.f32 1.442695, %v1229_v58 }
 0xc37   :  { %v1238_v5 = vpop.permute.xlu1 %1237 }
 0xc38   :  { %2114 = vpow2.f32 %v1230_v59 }
 0xc39   :  { %2116 = vrcp.f32 %v1068_v62 }
 0xc45   :  { %v2115_v60 = vpop.eup %2114 }
 0xc46   :  { %v1232_v61 = vsel %vm135_vm2, %v2115_v60, 0.0  ;;  %v2117_v1 = vpop.eup %2116 }
 0xc47   :  { %1233 = vadd.xlane.f32.xlu0 %v1232_v61  ;;  %v1070_v3 = vmul.f32 %v2117_v1, %v2113_v46 }
 0xc5d   :  { %1071 = vrot.lane.b32.xlu0 %v2291_v6, %s2216_s20 }
 0xc61   :  { %1402 = vrot.lane.b32.xlu0 %v2291_v6, %s2225_s7 }
 0xc65   :  { %1400 = vrot.lane.b32.xlu0 %v2291_v6, %s2226_s8 }
 0xcd0   :  { %v1234_v63 = vpop.xlane.xlu0 %1233 }
 0xcd1   :  { %2118 = vrcp.f32 %v1234_v63 }
 0xcd4   :  { %v1072_v2 = vpop.permute.xlu0 %1071 }
 0xcd5   :  { %2015 = vmatpush3.msra.mxu0 %v1072_v2 }
 0xcd6   :  { %2017 = vmatmul.mubr.msk.f32.vlgmr.msra.gmra.mxu0 %vm135_vm2, %v1070_v3  ;;  %2024 = vmatprep.subr.mxu0 %v2219_v0 }
 0xcd7   :  { %2025 = vmatpush3.msra.mxu0 %v1238_v5  ;;  %2026 = vmatprep.mubr.msk.f32.mxu0 %vm2220_vm0, %v2219_v0 }
 0xcd8   :  { %2035 = vmatprep.subr.bf16.mxu0 %v2219_v0  ;;  %v1403_v16 = vpop.permute.xlu0 %1402 }
 0xcde   :  { %v2119_v7 = vpop.eup %2118 }
 0xcdf   :  { %v1236_v8 = vmul.f32 %v2119_v7, %v2115_v60 }
 0xce1   :  { %2027 = vmatmul.mubr.msk.f32.vlgmr.msra.gmra.mxu0 %vm135_vm2, %v1236_v8 }
 0xce2   :  { %2036 = vmatpush3.bf16.msra.mxu0 %v2329_v40  ;;  %2037 = vmatprep.mubr.msk.bf16.mxu0 %vm2220_vm0, %v2219_v0  ;;  %v1401_v40 = vpop.permute.xlu0 %1400 }
 0xce3   :  { %2046 = vmatprep.subr.mxu0 %v2219_v0 }
 0xd96   :  { %v1143_v10 = vpop.f32.mrf.mxu0 }
 0xd97   :  { %v1147_v11 = vpack.c.bf16 %v1143_v10, %v1143_v10 }
 0xd98   :  { %v2018_v12 = vpop.f32.mrf.mxu0 }
 0xd99   :  { %2038 = vmatmul.mubr.msk.bf16.vlgmr.msra.gmra.mxu0 %vm135_vm2, %v1147_v11 }
 0xd9a   :  { %2048 = vmatprep.mubr.msk.f32.mxu0 %vm2220_vm0, %v2219_v0 }
 0xda1   :  { %v1309_v13 = vpop.f32.mrf.mxu0 }
 0xda2   :  { %v1313_v14 = vpack.c.bf16 %v1309_v13, %v1309_v13 }
 0xda3   :  { %v2028_v15 = vpop.f32.mrf.mxu0 }
 0xda4   :  { %2032 = vmatmul.mubr.msk.bf16.vlgmr.msra.gmra.mxu1 %vm135_vm2, %v1313_v14 }
 0xda5   :  { %2042 = vmatpush3.xpose.msk.msra.mxu1 %vm135_vm2, %v1403_v16  ;;  %2043 = vmatprep.mubr.msk.f32.mxu1 %vm2220_vm0, %v2219_v0 }
 0xda6   :  { %2051 = vmatprep.subr.bf16.mxu1 %v2219_v0 }
 0xdac   :  { %2044 = vmatmul.mubr.msk.f32.vlgmr.msra.gmra.mxu1 %vm135_vm2, %v1401_v40 }
 0xdad   :  { %2052 = vmatpush3.bf16.msra.mxu1 %v2367_v9  ;;  %2053 = vmatprep.mubr.msk.bf16.mxu1 %vm2220_vm0, %v2219_v0 }
 0xdae   :  { %2067 = vmatprep.subr.bf16.mxu1 %v2219_v0 }
 0xe59   :  { %v1394_v17 = vpop.f32.mrf.mxu0 }
 0xe5b   :  { %v2039_v18 = vpop.f32.mrf.mxu0 }
 0xe5d   :  { %v1397_v19 = vpop.f32.mrf.mxu0 }
 0xe5f   :  { %v2040_v20 = vpop.f32.mrf.mxu0 }
 0xe64   :  { %v1351_v21 = vpop.f32.mrf.mxu1 }
 0xe65   :  { %v1395_v22 = vadd.f32 %v1394_v17, %v1351_v21 }
 0xe66   :  { %v2033_v24 = vpop.f32.mrf.mxu1 }
 0xe68   :  { %v1354_v25 = vpop.f32.mrf.mxu1 }
 0xe6a   :  { %v2034_v26 = vpop.f32.mrf.mxu1 }
 0xe6c   :  { %v1474_v4 = vpop.f32.mrf.mxu1 }
 0xe6d   :  { %v1478_v27 = vsel %vm135_vm2, %v1474_v4, -inf }
 0xe6e   :  { %1479 = vmax.xlane.f32.xlu1 %v1478_v27  ;;  %v2045_v28 = vpop.f32.mrf.mxu1 }
 0xe7f   :  { %1612 = vrot.lane.b32.xlu1 %v2291_v6, %s2228_s10 }
 0xe83   :  { %1610 = vrot.lane.b32.xlu1 %v2291_v6, %s2229_s11 }
 0xef7   :  { %v1480_v9 = vpop.xlane.xlu1 %1479 }
 0xef8   :  { %v1481_v29 = vsub.f32 %v1474_v4, %v1480_v9 }
 0xefa   :  { %v1482_v30 = vmul.f32 1.442695, %v1481_v29 }
 0xefb   :  { %v1613_v37 = vpop.permute.xlu1 %1612 }
 0xefc   :  { %2120 = vpow2.f32 %v1482_v30 }
 0xeff   :  { %v1611_v39 = vpop.permute.xlu1 %1610 }
 0xf09   :  { %v2121_v31 = vpop.eup %2120 }
 0xf0a   :  { %v1484_v32 = vsel %vm135_vm2, %v2121_v31, 0.0 }
 0xf0b   :  { %1485 = vadd.xlane.f32.xlu0 %v1484_v32 }
 0xf21   :  { %1489 = vrot.lane.b32.xlu0 %v2291_v6, %s2227_s9 }
 0xf94   :  { %v1486_v33 = vpop.xlane.xlu0 %1485 }
 0xf95   :  { %2122 = vrcp.f32 %v1486_v33 }
 0xf98   :  { %v1490_v35 = vpop.permute.xlu0 %1489 }
 0xf99   :  { %2047 = vmatpush3.msra.mxu0 %v1490_v35 }
 0xf9a   :  { %2057 = vmatprep.subr.mxu0 %v2219_v0 }
 0xfa2   :  { %v2123_v36 = vpop.eup %2122 }
 0xfa3   :  { %v1488_v38 = vmul.f32 %v2123_v36, %v2121_v31 }
 0xfa5   :  { %2049 = vmatmul.mubr.msk.f32.vlgmr.msra.gmra.mxu0 %vm135_vm2, %v1488_v38 }
 0xfa6   :  { %2058 = vmatpush3.xpose.msk.msra.mxu0 %vm135_vm2, %v1613_v37  ;;  %2059 = vmatprep.mubr.msk.f32.mxu0 %vm2220_vm0, %v2219_v0 }
 0xfa7   :  { %2062 = vmatprep.subr.mxu0 %v2219_v0 }
 0xfa9   :  { %2060 = vmatmul.mubr.msk.f32.vlgmr.msra.gmra.mxu0 %vm135_vm2, %v1611_v39 }
 0xfaa   :  { %2064 = vmatprep.mubr.msk.f32.mxu0 %vm2220_vm0, %v2219_v0 }
0x1065   :  { %v1561_v41 = vpop.f32.mrf.mxu0 }
0x1066   :  { %v1565_v42 = vpack.c.bf16 %v1561_v41, %v1561_v41 }
0x1067   :  { %v2050_v43 = vpop.f32.mrf.mxu0 }
0x1068   :  { %2054 = vmatmul.mubr.msk.bf16.vlgmr.msra.gmra.mxu1 %vm135_vm2, %v1565_v42 }
0x1069   :  { %v1684_v44 = vpop.f32.mrf.mxu0  ;;  %2068 = vmatpush3.bf16.msra.mxu1 %v2386_v23  ;;  %2069 = vmatprep.mubr.msk.bf16.mxu1 %vm2220_vm0, %v2219_v0 }
0x106a   :  { %v1688_v45 = vsel %vm135_vm2, %v1684_v44, -inf }
0x106b   :  { %1689 = vmax.xlane.f32.xlu0 %v1688_v45  ;;  %v2061_v46 = vpop.f32.mrf.mxu0 }
0x1081   :  { %1699 = vrot.lane.b32.xlu0 %v2291_v6, %s2230_s12 }
0x10f4   :  { %v1690_v47 = vpop.xlane.xlu0 %1689 }
0x10f5   :  { %v1691_v48 = vsub.f32 %v1684_v44, %v1690_v47 }
0x10f7   :  { %v1692_v34 = vmul.f32 1.442695, %v1691_v48 }
0x10f8   :  { %v1700_v50 = vpop.permute.xlu0 %1699 }
0x10f9   :  { %2124 = vpow2.f32 %v1692_v34  ;;  %2063 = vmatpush3.msra.mxu0 %v1700_v50 }
0x1106   :  { %v2125_v51 = vpop.eup %2124 }
0x1107   :  { %v1694_v52 = vsel %vm135_vm2, %v2125_v51, 0.0 }
0x1108   :  { %1695 = vadd.xlane.f32.xlu1 %v1694_v52 }
0x1128   :  { %v1603_v23 = vpop.f32.mrf.mxu1 }
0x1129   :  { %v1609_v53 = vadd.f32 %v1603_v23, %v1395_v22 }
0x112a   :  { %v2055_v0 = vpop.f32.mrf.mxu1 }
0x112c   :  { %v1606_v54 = vpop.f32.mrf.mxu1 }
0x112e   :  { %v2056_v55 = vpop.f32.mrf.mxu1 }
0x1191   :  { %v1696_v56 = vpop.xlane.xlu1 %1695 }
0x1192   :  { %2126 = vrcp.f32 %v1696_v56 }
0x119f   :  { %v2127_v57 = vpop.eup %2126 }
0x11a0   :  { %v1698_v58 = vmul.f32 %v2127_v57, %v2125_v51 }
0x11a2   :  { %2065 = vmatmul.mubr.msk.f32.vlgmr.msra.gmra.mxu0 %vm135_vm2, %v1698_v58 }
0x1262   :  { %v1771_v6 = vpop.f32.mrf.mxu0 }
0x1263   :  { %v1775_v59 = vpack.c.bf16 %v1771_v6, %v1771_v6 }
0x1264   :  { %v2066_v60 = vpop.f32.mrf.mxu0 }
0x1265   :  { %2070 = vmatmul.mubr.msk.bf16.vlgmr.msra.gmra.mxu1 %vm135_vm2, %v1775_v59 }
0x1325   :  { %v1813_v61 = vpop.f32.mrf.mxu1 }
0x1326   :  { %v1819_v62 = vadd.f32 %v1813_v61, %v1609_v53 }
0x1327   :  { %v2071_v63 = vpop.f32.mrf.mxu1 }
0x1328   :  { %v1828_v1 = vadd.f32 %v2415_v49, %v1819_v62 }
0x1329   :  { %v1816_v2 = vpop.f32.mrf.mxu1 }
0x132a   :  { %1830 = vst.msk [vmem:[#allocation8 + $0x8] sm:$0xff] %vm87_vm1, %v1828_v1 }
0x132b   :  { %v2072_v3 = vpop.f32.mrf.mxu1 }
0x132c   :  { %2199 = shalt.err (!%p2196_p5)
}
0x132d   :  { %s2232_s17 = smov 128   ;;  %s2233_s18 = smov 8  }
0x132e   :  { %1842 = dma.vmem_to_hbm [thread:$0]  %s1837_s15, 256, %s2488_s4, [#allocation4], %s2232_s17, %s2232_s17, %s2233_s18  }
0x132f   :  { %2212 = dma.done.wait [#allocation4], 256  }
0x1330   :  { %2213 = vsyncadd [#allocation4], 4294967040 }
0x1331   :  { %1846 = vsyncpa [#allocation3], 1 }
0x1332   :  { %1847 = vsyncpa [#allocation6], 1 }
0x1333   :  { %1848 = vsyncpa [#allocation4], 1 }

</bundles_post_ra>
